<compile_context>
chip_gen: v7x
topology: tpu7x:2x2x1
jax: 0.10.0
libtpu: 0.0.40
codegen_flags: <defaults>
</compile_context>

<pallas_src>
import functools
from typing import NamedTuple

import jax
import jax.numpy as jnp
from jax.experimental import pallas as pl
from jax.experimental.pallas import tpu as pltpu

_IP = 128   # input features padded to a full 128-lane block (+ gumbel lanes)
_HP = 128   # hidden size padded to a full 128-lane block
_OW = 128   # combined output row width (lane-dense full-block store)


class Dims(NamedTuple):
    input_size: int
    hidden_size: int
    action_size: int
    out_size: int


# --------------------------------------------------------------------------
# Kernel: TT GRU steps + policy head + action sampling + prediction MLP
# --------------------------------------------------------------------------
def _model_kernel(is_greedy, in_dim, A, out_size,
                  x_ref, h0_ref,
                  wgru_ref, bgru_ref, wph_ref, bph_ref,
                  w1a_ref, w2_ref, b2_ref,
                  rnn_ref, out_ref, h_s):
    """h_s is a persistent (B, _HP) f32 scratch carrying h across grid steps;
    inside the chunk the recurrent carry lives in vregs via fori_loop."""
    TT, B, _ = x_ref.shape

    @pl.when(pl.program_id(0) == 0)
    def _():
        h_s[...] = h0_ref[...]

    # ---- loop-invariant values, hoisted out of the per-timestep loop -------
    bgru = bgru_ref[...]                                      # (1, 4*_HP) f32
    bph = bph_ref[...]                                        # (1, 2*_HP) f32
    b2 = b2_ref[...]                                          # (1, _OW)   f32
    w1a = w1a_ref[...]                                        # (A, _HP)   f32
    w1a_rows = [jnp.broadcast_to(w1a[j:j + 1, :], (B, _HP)) for j in range(A)]
    lane = jax.lax.broadcasted_iota(jnp.int32, (1, _OW), 1)
    logit_mask = (lane < A).astype(jnp.float32)               # logit lanes
    action_mask = (lane == out_size).astype(jnp.float32)      # packed-a lane
    aidx = jax.lax.broadcasted_iota(jnp.int32, (B, A), 1)

    def step(t, h):
        xt = x_ref[t]                                          # (B, _IP) f32

        # ---- fused GRU cell: one bf16 MXU pass over [x_t | h_{t-1}] --------
        xh = jnp.concatenate([xt, h], axis=-1).astype(jnp.bfloat16)
        gates = jnp.dot(xh, wgru_ref[...],
                        preferred_element_type=jnp.float32) + bgru
        r = jax.nn.sigmoid(gates[:, 0 * _HP:1 * _HP])          # gi_r+gh_r (+b)
        z = jax.nn.sigmoid(gates[:, 1 * _HP:2 * _HP])          # gi_z+gh_z (+b)
        n = jnp.tanh(gates[:, 2 * _HP:3 * _HP]                 # gi_n + b_ih_n
                     + r * gates[:, 3 * _HP:4 * _HP])          # r*(gh_n+b_hh_n)
        h_new = (1.0 - z) * n + z * h                          # f32 carry
        rnn_ref[t] = h_new                                     # lane-dense store

        # ---- fused policy head + layer-1(hidden) of the prediction MLP -----
        pv = jnp.dot(h_new.astype(jnp.bfloat16), wph_ref[...],
                     preferred_element_type=jnp.float32) + bph  # (B, 2*_HP)
        logits = pv[:, 0:A]
        m = jnp.max(logits, axis=-1, keepdims=True)
        lse = m + jnp.log(jnp.sum(jnp.exp(logits - m), axis=-1, keepdims=True))
        logpi = logits - lse

        # ---- action sampling: greedy argmax / Gumbel-max categorical -------
        if is_greedy:
            scores = logpi
        else:
            scores = logpi + xt[:, in_dim:in_dim + A]   # gumbel packed into x
        smax = jnp.max(scores, axis=-1, keepdims=True)
        a = jnp.min(jnp.where(scores == smax, aidx, A), axis=-1, keepdims=True)

        # layer-1 action contribution: one-hot row select on hoisted rows
        # (pure VPU selects; no (B,A,P) broadcast / cross-sublane reduction).
        act = w1a_rows[A - 1]
        for j in range(A - 2, -1, -1):
            act = jnp.where(a == j, w1a_rows[j], act)
        p1 = jnp.maximum(pv[:, _HP:2 * _HP] + act, 0.0)        # (B, _HP)
        # w2/b2 are padded so the prediction lands at lanes [A+1, A+1+P).
        p2 = jnp.dot(p1.astype(jnp.bfloat16), w2_ref[...],
                     preferred_element_type=jnp.float32) + b2  # (B, _OW)

        # ---- lane-dense output row; single full-block store -----------------
        head = pv[:, 0:_OW] - lse * logit_mask                 # logpi | V | 0s
        row = head + p2 + a.astype(jnp.float32) * action_mask
        out_ref[t] = row
        return h_new

    h_s[...] = jax.lax.fori_loop(0, TT, step, h_s[...])


# --------------------------------------------------------------------------
# Parameter preparation (done once, outside the per-step path)
# --------------------------------------------------------------------------
def fuse_params(params, *, input_size, hidden_size, action_size, out_size):
    """Build the fused / lane-aligned, bf16 weight layout used by the kernel."""
    I, H, A = input_size, hidden_size, action_size
    P = out_size - A - 1
    assert I <= _IP and H <= _HP and P >= 1
    assert out_size + 1 <= _OW, "need room for the packed action lane"

    w_ih, w_hh = params["w_ih"], params["w_hh"]      # (I, 3H), (H, 3H)
    b_ih, b_hh = params["b_ih"], params["b_hh"]      # (3H,),   (3H,)

    # Fused GRU weight: rows [x(128) | h(128)], columns = four 128-lane gate
    # blocks: r (x+h), z (x+h), n_input, n_hidden (multiplied by r in-kernel).
    w_gru = jnp.zeros((_IP + _HP, 4 * _HP), jnp.float32)
    b_gru = jnp.zeros((1, 4 * _HP), jnp.float32)
    w_gru = w_gru.at[:I, 0:H].set(w_ih[:, 0:H])
    w_gru = w_gru.at[_IP:_IP + H, 0:H].set(w_hh[:, 0:H])
    b_gru = b_gru.at[0, 0:H].set(b_ih[0:H] + b_hh[0:H])
    w_gru = w_gru.at[:I, _HP:_HP + H].set(w_ih[:, H:2 * H])
    w_gru = w_gru.at[_IP:_IP + H, _HP:_HP + H].set(w_hh[:, H:2 * H])
    b_gru = b_gru.at[0, _HP:_HP + H].set(b_ih[H:2 * H] + b_hh[H:2 * H])
    w_gru = w_gru.at[:I, 2 * _HP:2 * _HP + H].set(w_ih[:, 2 * H:3 * H])
    b_gru = b_gru.at[0, 2 * _HP:2 * _HP + H].set(b_ih[2 * H:3 * H])
    w_gru = w_gru.at[_IP:_IP + H, 3 * _HP:3 * _HP + H].set(w_hh[:, 2 * H:3 * H])
    b_gru = b_gru.at[0, 3 * _HP:3 * _HP + H].set(b_hh[2 * H:3 * H])

    # Policy head (logits|V) in the first 128-lane block; layer-1 hidden rows
    # of the prediction MLP in the second -> all downstream slices aligned.
    w_ph = jnp.zeros((_HP, 2 * _HP), jnp.float32)
    w_ph = w_ph.at[:H, :A + 1].set(params["w_p"])
    w_ph = w_ph.at[:H, _HP:_HP + P].set(params["w1"][:H, :])
    b_ph = jnp.zeros((1, 2 * _HP), jnp.float32)
    b_ph = b_ph.at[0, :A + 1].set(params["b_p"])
    b_ph = b_ph.at[0, _HP:_HP + P].set(params["b1"])

    # Action rows of layer 1 (selected per-row in-kernel; kept f32 / exact).
    w1_act = jnp.zeros((A, _HP), jnp.float32).at[:, :P].set(params["w1"][H:, :])

    # Layer 2 of the prediction MLP, padded so its output lands directly at
    # lanes [A+1, A+1+P) of the combined output row (no lane shift needed).
    w2 = jnp.zeros((_HP, _OW), jnp.float32)
    w2 = w2.at[:P, A + 1:A + 1 + P].set(params["w2"])
    b2 = jnp.zeros((1, _OW), jnp.float32).at[0, A + 1:A + 1 + P].set(params["b2"])

    return dict(
        w_gru=w_gru.astype(jnp.bfloat16), b_gru=b_gru,
        w_ph=w_ph.astype(jnp.bfloat16), b_ph=b_ph,
        w1_act=w1_act,
        w2=w2.astype(jnp.bfloat16), b2=b2,
    )


# --------------------------------------------------------------------------
# Forward wrapper
# --------------------------------------------------------------------------
@functools.partial(jax.jit, static_argnames=("dims", "is_greedy", "tt"))
def model_forward(fused, x, h, key, *, dims: Dims, is_greedy: bool = False,
                  tt: int = 32):
    """x: (B, T, I) f32, h: (1, B, H) f32 ->
       (rnn (B,T,H), h (1,B,H), cat(logpi,V,pred) (B,T,out), a (B,T) int32)."""
    I, H, A, out_size = dims
    B, T, _ = x.shape
    assert I + A <= _IP, "gumbel lanes must fit inside the padded x block"

    TT = max(1, min(tt, T))          # timesteps per grid step
    grid_t = pl.cdiv(T, TT)
    T_pad = grid_t * TT              # padded rollout (extra steps discarded)

    # Time-major, lane-padded input; the Gumbel noise rides in the otherwise
    # unused lanes [I, I+A) -> no separate pipelined noise stream.
    x_p = jnp.zeros((T_pad, B, _IP), jnp.float32)
    x_p = x_p.at[:T, :, :I].set(jnp.transpose(x.astype(jnp.float32), (1, 0, 2)))
    if not is_greedy:
        # TODO(synk): torch uses Categorical/multinomial sampling plus a per-row
        # NaN/Inf fallback; Gumbel-max is distribution-equivalent for finite
        # logits but not bitwise identical.
        g = jax.random.gumbel(key, (T, B, A), jnp.float32)
        x_p = x_p.at[:T, :, I:I + A].set(g)
    h0_p = jnp.zeros((B, _HP), jnp.float32).at[:, :H].set(h[0].astype(jnp.float32))

    kernel = functools.partial(_model_kernel, is_greedy, I, A, out_size)
    const2 = lambda i: (0, 0)

    rnn_p, comb_p = pl.pallas_call(
        kernel,
        grid=(grid_t,),
        in_specs=[
            pl.BlockSpec((TT, B, _IP), lambda i: (i, 0, 0)),   # x (+gumbel)
            pl.BlockSpec((B, _HP), const2),                    # h0 (read @ t=0)
            pl.BlockSpec(fused["w_gru"].shape, const2),        # weights stay
            pl.BlockSpec(fused["b_gru"].shape, const2),        # VMEM-resident
            pl.BlockSpec(fused["w_ph"].shape, const2),
            pl.BlockSpec(fused["b_ph"].shape, const2),
            pl.BlockSpec(fused["w1_act"].shape, const2),
            pl.BlockSpec(fused["w2"].shape, const2),
            pl.BlockSpec(fused["b2"].shape, const2),
        ],
        out_specs=(
            pl.BlockSpec((TT, B, _HP), lambda i: (i, 0, 0)),   # padded h_t
            pl.BlockSpec((TT, B, _OW), lambda i: (i, 0, 0)),   # logpi|V|pred|a
        ),
        out_shape=(
            jax.ShapeDtypeStruct((T_pad, B, _HP), jnp.float32),
            jax.ShapeDtypeStruct((T_pad, B, _OW), jnp.float32),
        ),
        scratch_shapes=[pltpu.VMEM((B, _HP), jnp.float32)],    # h carry
        compiler_params=pltpu.CompilerParams(
            dimension_semantics=("arbitrary",)),   # recurrent carry across steps
        # TODO(synk): for large serving batches on v7x, add a leading "parallel"
        # batch grid axis so B is split across the two TensorCores.
    )(x_p, h0_p,
      fused["w_gru"], fused["b_gru"], fused["w_ph"], fused["b_ph"],
      fused["w1_act"], fused["w2"], fused["b2"])

    rnn = jnp.transpose(rnn_p[:T, :, :H], (1, 0, 2))              # (B, T, H)
    h_out = rnn_p[T - 1, :, :H][None]                             # (1, B, H)
    out = jnp.transpose(comb_p[:T, :, :out_size], (1, 0, 2))      # (B, T, out)
    # The action was packed as an exact small integer into an f32 lane.
    a = jnp.transpose(comb_p[:T, :, out_size]).astype(jnp.int32)  # (B, T)
    return rnn, h_out, out, a


# --------------------------------------------------------------------------
# Parameters (PyTorch-style uniform init, weights stored as (in, out))
# --------------------------------------------------------------------------
def init_params(key, input_size, hidden_size, action_size, out_size):
    pre_in = hidden_size + action_size
    pre_out = out_size - action_size - 1
    pol_out = action_size + 1
    ks = jax.random.split(key, 10)

    def u(k, shape, fan_in):
        bound = 1.0 / jnp.sqrt(fan_in)
        return jax.random.uniform(k, shape, jnp.float32, -bound, bound)

    return {
        "w_ih": u(ks[0], (input_size, 3 * hidden_size), hidden_size),
        "w_hh": u(ks[1], (hidden_size, 3 * hidden_size), hidden_size),
        "b_ih": u(ks[2], (3 * hidden_size,), hidden_size),
        "b_hh": u(ks[3], (3 * hidden_size,), hidden_size),
        "w_p": u(ks[4], (hidden_size, pol_out), hidden_size),
        "b_p": u(ks[5], (pol_out,), hidden_size),
        "w1": u(ks[6], (pre_in, pre_out), pre_in),
        "b1": u(ks[7], (pre_out,), pre_in),
        "w2": u(ks[8], (pre_out, pre_out), pre_out),
        "b2": u(ks[9], (pre_out,), pre_out),
    }


def reference_forward_greedy(params, x, h0):
    """Pure-JAX greedy reference mirroring the kernel's dtype policy
    (bf16 matmul operands, f32 accumulation/elementwise)."""
    H = params["w_hh"].shape[0]
    A = params["w_p"].shape[1] - 1
    B, T, _ = x.shape

    def mm(a, w):
        return jnp.dot(a.astype(jnp.bfloat16), w.astype(jnp.bfloat16),
                       preferred_element_type=jnp.float32)

    h = h0[0]
    rnn_l, comb_l, a_l = [], [], []
    for t in range(T):
        xt = x[:, t, :]
        gi = mm(xt, params["w_ih"]) + params["b_ih"]
        gh = mm(h, params["w_hh"]) + params["b_hh"]
        r = jax.nn.sigmoid(gi[:, :H] + gh[:, :H])
        z = jax.nn.sigmoid(gi[:, H:2 * H] + gh[:, H:2 * H])
        n = jnp.tanh(gi[:, 2 * H:] + r * gh[:, 2 * H:])
        h = (1 - z) * n + z * h
        policy = mm(h, params["w_p"]) + params["b_p"]
        logits, V = policy[:, :A], policy[:, A:A + 1]
        logpi = logits - jax.scipy.special.logsumexp(logits, axis=-1,
                                                     keepdims=True)
        a = jnp.argmax(logpi, axis=-1)
        ahot = jax.nn.one_hot(a, A, dtype=jnp.float32)
        p1 = jax.nn.relu(mm(h, params["w1"][:H]) + ahot @ params["w1"][H:]
                         + params["b1"])
        p2 = mm(p1, params["w2"]) + params["b2"]
        rnn_l.append(h)
        comb_l.append(jnp.concatenate([logpi, V, p2], axis=-1))
        a_l.append(a.astype(jnp.int32))
    return (jnp.stack(rnn_l, 1), h[None], jnp.stack(comb_l, 1),
            jnp.stack(a_l, 1))


if __name__ == "__main__":
    # Small ModelProperties-consistent sizes (batch padded to >= 8 sublanes).
    batch, input_size, hidden_size = 8, 24, 32
    action_size, out_size = 4, 16      # pre_out=11, policy_out=5, pre_in=36
    T = 7                              # multi-chunk rollout (TT=4 -> 2 grid steps)

    key = jax.random.PRNGKey(0)
    kp, kx, kh, ks = jax.random.split(key, 4)
    params = init_params(kp, input_size, hidden_size, action_size, out_size)
    fused = fuse_params(params, input_size=input_size,
                        hidden_size=hidden_size, action_size=action_size,
                        out_size=out_size)
    dims = Dims(input_size, hidden_size, action_size, out_size)

    x = jax.random.normal(kx, (batch, T, input_size), jnp.float32)
    h0 = jax.random.normal(kh, (1, batch, hidden_size), jnp.float32)

    # Greedy rollout, checked against the pure-JAX reference.
    rnn, h1, comb, a = model_forward(fused, x, h0, ks, dims=dims,
                                     is_greedy=True, tt=4)
    jax.block_until_ready((rnn, h1, comb, a))
    rnn_r, h_r, comb_r, a_r = reference_forward_greedy(params, x, h0)
    assert rnn.shape == rnn_r.shape and comb.shape == comb_r.shape
    assert jnp.allclose(rnn, rnn_r, atol=2e-3, rtol=2e-3)
    assert jnp.allclose(h1, h_r, atol=2e-3, rtol=2e-3)
    assert jnp.allclose(comb, comb_r, atol=2e-3, rtol=2e-3)
    assert jnp.array_equal(a, a_r)

    # Single-step stochastic path (matches the PyTorch forward's T == 1 use).
    x1 = x[:, :1, :]
    rnn_s, h1_s, comb_s, a_s = model_forward(fused, x1, h0, ks, dims=dims,
                                             is_greedy=False, tt=4)
    jax.block_until_ready((rnn_s, h1_s, comb_s, a_s))
    assert rnn_s.shape == (batch, 1, hidden_size)
    assert h1_s.shape == (1, batch, hidden_size)
    assert comb_s.shape == (batch, 1, out_size)
    assert a_s.shape == (batch, 1) and a_s.dtype == jnp.int32
    assert bool(jnp.all((a_s >= 0) & (a_s < action_size)))
    # GRU / logpi / V do not depend on the sampling path.
    assert jnp.allclose(rnn_s, rnn[:, :1, :], atol=2e-3, rtol=2e-3)
    assert jnp.allclose(comb_s[:, :, :action_size + 1],
                        comb[:, :1, :action_size + 1], atol=2e-3, rtol=2e-3)

    print("KERNEL_OK")
</pallas_src>

<mosaic_0001>
module attributes {stable_mosaic.version = 11 : i64} {
  func.func @_model_kernel(%arg0: i32, %arg1: memref<4x8x128xf32, #tpu.memory_space<vmem>>, %arg2: memref<8x128xf32, #tpu.memory_space<vmem>>, %arg3: memref<256x512xbf16, #tpu.memory_space<vmem>>, %arg4: memref<1x512xf32, #tpu.memory_space<vmem>>, %arg5: memref<128x256xbf16, #tpu.memory_space<vmem>>, %arg6: memref<1x256xf32, #tpu.memory_space<vmem>>, %arg7: memref<4x128xf32, #tpu.memory_space<vmem>>, %arg8: memref<128x128xbf16, #tpu.memory_space<vmem>>, %arg9: memref<1x128xf32, #tpu.memory_space<vmem>>, %arg10: memref<4x8x128xf32, #tpu.memory_space<vmem>>, %arg11: memref<4x8x128xf32, #tpu.memory_space<vmem>>, %arg12: memref<8x128xf32, #tpu.memory_space<vmem>>) attributes {dimension_semantics = [#tpu.dimension_semantics<arbitrary>], iteration_bounds = array<i64: 2>, scalar_prefetch = 0 : i64, scratch_operands = 1 : i64, tpu.core_type = #tpu.core_type<tc>, window_params = [{transform_indices = @transform_0, window_bounds = array<i64: 4, 8, 128>}, {pipeline_mode = #tpu.pipeline_mode<synchronous>, transform_indices = @transform_1, window_bounds = array<i64: 8, 128>}, {pipeline_mode = #tpu.pipeline_mode<synchronous>, transform_indices = @transform_2, window_bounds = array<i64: 256, 512>}, {pipeline_mode = #tpu.pipeline_mode<synchronous>, transform_indices = @transform_3, window_bounds = array<i64: 1, 512>}, {pipeline_mode = #tpu.pipeline_mode<synchronous>, transform_indices = @transform_4, window_bounds = array<i64: 128, 256>}, {pipeline_mode = #tpu.pipeline_mode<synchronous>, transform_indices = @transform_5, window_bounds = array<i64: 1, 256>}, {pipeline_mode = #tpu.pipeline_mode<synchronous>, transform_indices = @transform_6, window_bounds = array<i64: 4, 128>}, {pipeline_mode = #tpu.pipeline_mode<synchronous>, transform_indices = @transform_7, window_bounds = array<i64: 128, 128>}, {pipeline_mode = #tpu.pipeline_mode<synchronous>, transform_indices = @transform_8, window_bounds = array<i64: 1, 128>}, {transform_indices = @transform_9, window_bounds = array<i64: 4, 8, 128>}, {transform_indices = @transform_10, window_bounds = array<i64: 4, 8, 128>}]} {
    %c0_i32 = arith.constant 0 : i32
    %0 = arith.cmpi eq, %arg0, %c0_i32 : i32
    %1 = arith.extui %0 : i1 to i32
    %c0_i32_0 = arith.constant 0 : i32
    %2 = arith.cmpi ne, %1, %c0_i32_0 : i32
    scf.if %2 {
      %c0_15 = arith.constant 0 : index
      %c0_16 = arith.constant 0 : index
      %33 = vector.load %arg2[%c0_15, %c0_16] : memref<8x128xf32, #tpu.memory_space<vmem>>, vector<8x128xf32>
      %c0_17 = arith.constant 0 : index
      %c0_18 = arith.constant 0 : index
      %34 = vector.load %arg12[%c0_17, %c0_18] : memref<8x128xf32, #tpu.memory_space<vmem>>, vector<8x128xf32>
      tpu.vector_store %arg12[%c0_17, %c0_18], %33 {strides = array<i32>} : memref<8x128xf32, #tpu.memory_space<vmem>>, vector<8x128xf32>,
    } else {
    }
    %c0 = arith.constant 0 : index
    %c0_1 = arith.constant 0 : index
    %3 = vector.load %arg4[%c0, %c0_1] : memref<1x512xf32, #tpu.memory_space<vmem>>, vector<1x512xf32>
    %c0_2 = arith.constant 0 : index
    %c0_3 = arith.constant 0 : index
    %4 = vector.load %arg6[%c0_2, %c0_3] : memref<1x256xf32, #tpu.memory_space<vmem>>, vector<1x256xf32>
    %c0_4 = arith.constant 0 : index
    %c0_5 = arith.constant 0 : index
    %5 = vector.load %arg9[%c0_4, %c0_5] : memref<1x128xf32, #tpu.memory_space<vmem>>, vector<1x128xf32>
    %c0_6 = arith.constant 0 : index
    %c0_7 = arith.constant 0 : index
    %6 = vector.load %arg7[%c0_6, %c0_7] : memref<4x128xf32, #tpu.memory_space<vmem>>, vector<4x128xf32>
    %7 = vector.extract_strided_slice %6 {offsets = [0, 0], sizes = [1, 128], strides = [1, 1]} : vector<4x128xf32> to vector<1x128xf32>
    %8 = vector.shape_cast %7 : vector<1x128xf32> to vector<1x128xf32>
    %9 = vector.broadcast %8 : vector<1x128xf32> to vector<8x128xf32>
    %10 = vector.extract_strided_slice %6 {offsets = [1, 0], sizes = [1, 128], strides = [1, 1]} : vector<4x128xf32> to vector<1x128xf32>
    %11 = vector.shape_cast %10 : vector<1x128xf32> to vector<1x128xf32>
    %12 = vector.broadcast %11 : vector<1x128xf32> to vector<8x128xf32>
    %13 = vector.extract_strided_slice %6 {offsets = [2, 0], sizes = [1, 128], strides = [1, 1]} : vector<4x128xf32> to vector<1x128xf32>
    %14 = vector.shape_cast %13 : vector<1x128xf32> to vector<1x128xf32>
    %15 = vector.broadcast %14 : vector<1x128xf32> to vector<8x128xf32>
    %16 = vector.extract_strided_slice %6 {offsets = [3, 0], sizes = [1, 128], strides = [1, 1]} : vector<4x128xf32> to vector<1x128xf32>
    %17 = vector.shape_cast %16 : vector<1x128xf32> to vector<1x128xf32>
    %18 = vector.broadcast %17 : vector<1x128xf32> to vector<8x128xf32>
    %19 = tpu.iota {dimensions = array<i32: 1>} : vector<1x128xi32>
    %c4_i32 = arith.constant 4 : i32
    %20 = vector.broadcast %c4_i32 : i32 to vector<1x128xi32>
    %21 = arith.cmpi slt, %19, %20 : vector<1x128xi32>
    %22 = arith.extui %21 : vector<1x128xi1> to vector<1x128xi32>
    %23 = arith.sitofp %22 : vector<1x128xi32> to vector<1x128xf32>
    %c16_i32 = arith.constant 16 : i32
    %24 = vector.broadcast %c16_i32 : i32 to vector<1x128xi32>
    %25 = arith.cmpi eq, %19, %24 : vector<1x128xi32>
    %26 = arith.extui %25 : vector<1x128xi1> to vector<1x128xi32>
    %27 = arith.sitofp %26 : vector<1x128xi32> to vector<1x128xf32>
    %28 = tpu.iota {dimensions = array<i32: 1>} : vector<8x4xi32>
    %c0_8 = arith.constant 0 : index
    %c0_9 = arith.constant 0 : index
    %29 = vector.load %arg12[%c0_8, %c0_9] : memref<8x128xf32, #tpu.memory_space<vmem>>, vector<8x128xf32>
    %c0_i32_10 = arith.constant 0 : i32
    %c4_i32_11 = arith.constant 4 : i32
    %30 = arith.addi %c0_i32_10, %c4_i32_11 : i32
    %c1_i32 = arith.constant 1 : i32
    %31 = scf.for %arg13 = %c0_i32_10 to %30 step %c1_i32 iter_args(%arg14 = %29) -> (vector<8x128xf32>)  : i32 {
      %33 = arith.index_cast %arg13 : i32 to index
      %c0_15 = arith.constant 0 : index
      %c0_16 = arith.constant 0 : index
      %34 = vector.load %arg1[%33, %c0_15, %c0_16] : memref<4x8x128xf32, #tpu.memory_space<vmem>>, vector<1x8x128xf32>
      %35 = vector.shape_cast %34 : vector<1x8x128xf32> to vector<8x128xf32>
      %36 = tpu.concatenate %35, %arg14 in 1 : vector<8x128xf32>, vector<8x128xf32> -> vector<8x256xf32>
      %37 = arith.truncf %36 : vector<8x256xf32> to vector<8x256xbf16>
      %c0_17 = arith.constant 0 : index
      %c0_18 = arith.constant 0 : index
      %38 = vector.load %arg3[%c0_17, %c0_18] : memref<256x512xbf16, #tpu.memory_space<vmem>>, vector<256x512xbf16>
      %cst = arith.constant dense<0.000000e+00> : vector<8x512xf32>
      %39 = tpu.matmul %37, %38, %cst {dimension_numbers = #tpu.dot_dimension_numbers<[1], [0], [0], [1], [0, 0, 1, 1], [], []>} : vector<8x256xbf16>, vector<256x512xbf16>, vector<8x512xf32> -> vector<8x512xf32>
      %40 = vector.broadcast %3 : vector<1x512xf32> to vector<8x512xf32>
      %41 = arith.addf %39, %40 : vector<8x512xf32>
      %42 = vector.extract_strided_slice %41 {offsets = [0, 0], sizes = [8, 128], strides = [1, 1]} : vector<8x512xf32> to vector<8x128xf32>
      %43 = arith.negf %42 : vector<8x128xf32>
      %44 = math.exp %43 : vector<8x128xf32>
      %cst_19 = arith.constant 1.000000e+00 : f32
      %45 = vector.broadcast %cst_19 : f32 to vector<8x128xf32>
      %46 = arith.addf %45, %44 : vector<8x128xf32>
      %47 = arith.divf %45, %46 : vector<8x128xf32>
      %48 = vector.extract_strided_slice %41 {offsets = [0, 128], sizes = [8, 128], strides = [1, 1]} : vector<8x512xf32> to vector<8x128xf32>
      %49 = arith.negf %48 : vector<8x128xf32>
      %50 = math.exp %49 : vector<8x128xf32>
      %cst_20 = arith.constant 1.000000e+00 : f32
      %51 = vector.broadcast %cst_20 : f32 to vector<8x128xf32>
      %52 = arith.addf %51, %50 : vector<8x128xf32>
      %53 = arith.divf %51, %52 : vector<8x128xf32>
      %54 = vector.extract_strided_slice %41 {offsets = [0, 256], sizes = [8, 128], strides = [1, 1]} : vector<8x512xf32> to vector<8x128xf32>
      %55 = vector.extract_strided_slice %41 {offsets = [0, 384], sizes = [8, 128], strides = [1, 1]} : vector<8x512xf32> to vector<8x128xf32>
      %56 = arith.mulf %47, %55 : vector<8x128xf32>
      %57 = arith.addf %54, %56 : vector<8x128xf32>
      %58 = math.tanh %57 : vector<8x128xf32>
      %cst_21 = arith.constant 1.000000e+00 : f32
      %59 = vector.broadcast %cst_21 : f32 to vector<8x128xf32>
      %60 = arith.subf %59, %53 : vector<8x128xf32>
      %61 = arith.mulf %60, %58 : vector<8x128xf32>
      %62 = arith.mulf %53, %arg14 : vector<8x128xf32>
      %63 = arith.addf %61, %62 : vector<8x128xf32>
      %64 = arith.index_cast %arg13 : i32 to index
      %c0_22 = arith.constant 0 : index
      %c0_23 = arith.constant 0 : index
      %65 = vector.load %arg10[%64, %c0_22, %c0_23] : memref<4x8x128xf32, #tpu.memory_space<vmem>>, vector<1x8x128xf32>
      %66 = vector.shape_cast %65 : vector<1x8x128xf32> to vector<8x128xf32>
      %67 = vector.shape_cast %63 : vector<8x128xf32> to vector<1x8x128xf32>
      tpu.vector_store %arg10[%64, %c0_22, %c0_23], %67 {strides = array<i32>} : memref<4x8x128xf32, #tpu.memory_space<vmem>>, vector<1x8x128xf32>,
      %68 = arith.truncf %63 : vector<8x128xf32> to vector<8x128xbf16>
      %c0_24 = arith.constant 0 : index
      %c0_25 = arith.constant 0 : index
      %69 = vector.load %arg5[%c0_24, %c0_25] : memref<128x256xbf16, #tpu.memory_space<vmem>>, vector<128x256xbf16>
      %cst_26 = arith.constant dense<0.000000e+00> : vector<8x256xf32>
      %70 = tpu.matmul %68, %69, %cst_26 {dimension_numbers = #tpu.dot_dimension_numbers<[1], [0], [0], [1], [0, 0, 1, 1], [], []>} : vector<8x128xbf16>, vector<128x256xbf16>, vector<8x256xf32> -> vector<8x256xf32>
      %71 = vector.broadcast %4 : vector<1x256xf32> to vector<8x256xf32>
      %72 = arith.addf %70, %71 : vector<8x256xf32>
      %73 = vector.extract_strided_slice %72 {offsets = [0, 0], sizes = [8, 4], strides = [1, 1]} : vector<8x256xf32> to vector<8x4xf32>
      %cst_27 = arith.constant dense<0xFF800000> : vector<8xf32>
      %74 = vector.multi_reduction <maximumf>, %73, %cst_27 [1] : vector<8x4xf32> to vector<8xf32>
      %75 = vector.shape_cast %74 : vector<8xf32> to vector<8x1xf32>
      %76 = vector.broadcast %75 : vector<8x1xf32> to vector<8x4xf32>
      %77 = arith.subf %73, %76 : vector<8x4xf32>
      %78 = math.exp %77 : vector<8x4xf32>
      %cst_28 = arith.constant dense<0.000000e+00> : vector<8xf32>
      %79 = vector.multi_reduction <add>, %78, %cst_28 [1] : vector<8x4xf32> to vector<8xf32>
      %80 = vector.shape_cast %79 : vector<8xf32> to vector<8x1xf32>
      %81 = math.log %80 : vector<8x1xf32>
      %82 = arith.addf %75, %81 : vector<8x1xf32>
      %83 = vector.broadcast %82 : vector<8x1xf32> to vector<8x4xf32>
      %84 = arith.subf %73, %83 : vector<8x4xf32>
      %cst_29 = arith.constant dense<0xFF800000> : vector<8xf32>
      %85 = vector.multi_reduction <maximumf>, %84, %cst_29 [1] : vector<8x4xf32> to vector<8xf32>
      %86 = vector.shape_cast %85 : vector<8xf32> to vector<8x1xf32>
      %87 = vector.broadcast %86 : vector<8x1xf32> to vector<8x4xf32>
      %88 = arith.cmpf oeq, %84, %87 : vector<8x4xf32>
      %c4_i32_30 = arith.constant 4 : i32
      %89 = vector.broadcast %c4_i32_30 : i32 to vector<8x4xi32>
      %90 = arith.select %88, %28, %89 : vector<8x4xi1>, vector<8x4xi32>
      %cst_31 = arith.constant dense<2147483647> : vector<8xi32>
      %91 = vector.multi_reduction <minsi>, %90, %cst_31 [1] : vector<8x4xi32> to vector<8xi32>
      %92 = vector.shape_cast %91 : vector<8xi32> to vector<8x1xi32>
      %c2_i32 = arith.constant 2 : i32
      %93 = vector.broadcast %c2_i32 : i32 to vector<8x1xi32>
      %94 = arith.cmpi eq, %92, %93 : vector<8x1xi32>
      %95 = vector.shape_cast %94 : vector<8x1xi1> to vector<8x1xi1>
      %96 = vector.broadcast %95 : vector<8x1xi1> to vector<8x128xi1>
      %97 = arith.select %96, %15, %18 : vector<8x128xi1>, vector<8x128xf32>
      %c1_i32_32 = arith.constant 1 : i32
      %98 = vector.broadcast %c1_i32_32 : i32 to vector<8x1xi32>
      %99 = arith.cmpi eq, %92, %98 : vector<8x1xi32>
      %100 = vector.shape_cast %99 : vector<8x1xi1> to vector<8x1xi1>
      %101 = vector.broadcast %100 : vector<8x1xi1> to vector<8x128xi1>
      %102 = arith.select %101, %12, %97 : vector<8x128xi1>, vector<8x128xf32>
      %c0_i32_33 = arith.constant 0 : i32
      %103 = vector.broadcast %c0_i32_33 : i32 to vector<8x1xi32>
      %104 = arith.cmpi eq, %92, %103 : vector<8x1xi32>
      %105 = vector.shape_cast %104 : vector<8x1xi1> to vector<8x1xi1>
      %106 = vector.broadcast %105 : vector<8x1xi1> to vector<8x128xi1>
      %107 = arith.select %106, %9, %102 : vector<8x128xi1>, vector<8x128xf32>
      %108 = vector.extract_strided_slice %72 {offsets = [0, 128], sizes = [8, 128], strides = [1, 1]} : vector<8x256xf32> to vector<8x128xf32>
      %109 = arith.addf %108, %107 : vector<8x128xf32>
      %cst_34 = arith.constant 0.000000e+00 : f32
      %110 = vector.broadcast %cst_34 : f32 to vector<8x128xf32>
      %111 = arith.maximumf %109, %110 : vector<8x128xf32>
      %112 = arith.truncf %111 : vector<8x128xf32> to vector<8x128xbf16>
      %c0_35 = arith.constant 0 : index
      %c0_36 = arith.constant 0 : index
      %113 = vector.load %arg8[%c0_35, %c0_36] : memref<128x128xbf16, #tpu.memory_space<vmem>>, vector<128x128xbf16>
      %cst_37 = arith.constant dense<0.000000e+00> : vector<8x128xf32>
      %114 = tpu.matmul %112, %113, %cst_37 {dimension_numbers = #tpu.dot_dimension_numbers<[1], [0], [0], [1], [0, 0, 1, 1], [], []>} : vector<8x128xbf16>, vector<128x128xbf16>, vector<8x128xf32> -> vector<8x128xf32>
      %115 = vector.broadcast %5 : vector<1x128xf32> to vector<8x128xf32>
      %116 = arith.addf %114, %115 : vector<8x128xf32>
      %117 = vector.extract_strided_slice %72 {offsets = [0, 0], sizes = [8, 128], strides = [1, 1]} : vector<8x256xf32> to vector<8x128xf32>
      %118 = vector.broadcast %82 : vector<8x1xf32> to vector<8x128xf32>
      %119 = vector.broadcast %23 : vector<1x128xf32> to vector<8x128xf32>
      %120 = arith.mulf %118, %119 : vector<8x128xf32>
      %121 = arith.subf %117, %120 : vector<8x128xf32>
      %122 = arith.addf %121, %116 : vector<8x128xf32>
      %123 = arith.sitofp %92 : vector<8x1xi32> to vector<8x1xf32>
      %124 = vector.broadcast %123 : vector<8x1xf32> to vector<8x128xf32>
      %125 = vector.broadcast %27 : vector<1x128xf32> to vector<8x128xf32>
      %126 = arith.mulf %124, %125 : vector<8x128xf32>
      %127 = arith.addf %122, %126 : vector<8x128xf32>
      %128 = arith.index_cast %arg13 : i32 to index
      %c0_38 = arith.constant 0 : index
      %c0_39 = arith.constant 0 : index
      %129 = vector.load %arg11[%128, %c0_38, %c0_39] : memref<4x8x128xf32, #tpu.memory_space<vmem>>, vector<1x8x128xf32>
      %130 = vector.shape_cast %129 : vector<1x8x128xf32> to vector<8x128xf32>
      %131 = vector.shape_cast %127 : vector<8x128xf32> to vector<1x8x128xf32>
      tpu.vector_store %arg11[%128, %c0_38, %c0_39], %131 {strides = array<i32>} : memref<4x8x128xf32, #tpu.memory_space<vmem>>, vector<1x8x128xf32>,
      scf.yield %63 : vector<8x128xf32>
    }
    %c4_i32_12 = arith.constant 4 : i32
    %c0_13 = arith.constant 0 : index
    %c0_14 = arith.constant 0 : index
    %32 = vector.load %arg12[%c0_13, %c0_14] : memref<8x128xf32, #tpu.memory_space<vmem>>, vector<8x128xf32>
    tpu.vector_store %arg12[%c0_13, %c0_14], %31 {strides = array<i32>} : memref<8x128xf32, #tpu.memory_space<vmem>>, vector<8x128xf32>,
    return
  }
  func.func @transform_0(%arg0: i32) -> (i32, i32, i32) {
    %c0_i32 = arith.constant 0 : i32
    %c0_i32_0 = arith.constant 0 : i32
    %c0_i32_1 = arith.constant 0 : i32
    return %arg0, %c0_i32, %c0_i32_0 : i32, i32, i32
  }
  func.func @transform_1(%arg0: i32) -> (i32, i32) {
    %c0_i32 = arith.constant 0 : i32
    %c0_i32_0 = arith.constant 0 : i32
    %c0_i32_1 = arith.constant 0 : i32
    return %c0_i32, %c0_i32_0 : i32, i32
  }
  func.func @transform_2(%arg0: i32) -> (i32, i32) {
    %c0_i32 = arith.constant 0 : i32
    %c0_i32_0 = arith.constant 0 : i32
    %c0_i32_1 = arith.constant 0 : i32
    return %c0_i32, %c0_i32_0 : i32, i32
  }
  func.func @transform_3(%arg0: i32) -> (i32, i32) {
    %c0_i32 = arith.constant 0 : i32
    %c0_i32_0 = arith.constant 0 : i32
    %c0_i32_1 = arith.constant 0 : i32
    return %c0_i32, %c0_i32_0 : i32, i32
  }
  func.func @transform_4(%arg0: i32) -> (i32, i32) {
    %c0_i32 = arith.constant 0 : i32
    %c0_i32_0 = arith.constant 0 : i32
    %c0_i32_1 = arith.constant 0 : i32
    return %c0_i32, %c0_i32_0 : i32, i32
  }
  func.func @transform_5(%arg0: i32) -> (i32, i32) {
    %c0_i32 = arith.constant 0 : i32
    %c0_i32_0 = arith.constant 0 : i32
    %c0_i32_1 = arith.constant 0 : i32
    return %c0_i32, %c0_i32_0 : i32, i32
  }
  func.func @transform_6(%arg0: i32) -> (i32, i32) {
    %c0_i32 = arith.constant 0 : i32
    %c0_i32_0 = arith.constant 0 : i32
    %c0_i32_1 = arith.constant 0 : i32
    return %c0_i32, %c0_i32_0 : i32, i32
  }
  func.func @transform_7(%arg0: i32) -> (i32, i32) {
    %c0_i32 = arith.constant 0 : i32
    %c0_i32_0 = arith.constant 0 : i32
    %c0_i32_1 = arith.constant 0 : i32
    return %c0_i32, %c0_i32_0 : i32, i32
  }
  func.func @transform_8(%arg0: i32) -> (i32, i32) {
    %c0_i32 = arith.constant 0 : i32
    %c0_i32_0 = arith.constant 0 : i32
    %c0_i32_1 = arith.constant 0 : i32
    return %c0_i32, %c0_i32_0 : i32, i32
  }
  func.func @transform_9(%arg0: i32) -> (i32, i32, i32) {
    %c0_i32 = arith.constant 0 : i32
    %c0_i32_0 = arith.constant 0 : i32
    %c0_i32_1 = arith.constant 0 : i32
    return %arg0, %c0_i32, %c0_i32_0 : i32, i32, i32
  }
  func.func @transform_10(%arg0: i32) -> (i32, i32, i32) {
    %c0_i32 = arith.constant 0 : i32
    %c0_i32_0 = arith.constant 0 : i32
    %c0_i32_1 = arith.constant 0 : i32
    return %arg0, %c0_i32, %c0_i32_0 : i32, i32, i32
  }
}

</mosaic_0001>

<bundles_post_ra>
// kernel: model_forward.1
= control target key start
LH: loop header
LB: loop body
LE: loop exit
PB: predicated region body
PF: predicated region fallthrough
CT: control target
= control target key end

     0   :  { %16 = vsyncpa [#allocation4], 0  ;;  %s2531_s0 = inlined_call_operand.vmem [shape: f32[8,8,128], index: 0, kind: input, shape index: {}]   ;;  %s2532_s1 = inlined_call_operand.vmem [shape: f32[8,128], index: 1, kind: input, shape index: {}]   ;;  %s2533_s2 = inlined_call_operand.hbm [shape: bf16[256,512], index: 2, kind: input, shape index: {}]   ;;  %s2534_s3 = inlined_call_operand.hbm [shape: f32[1,512], index: 3, kind: input, shape index: {}]   ;;  %s2535_s4 = inlined_call_operand.vmem [shape: bf16[128,256], index: 4, kind: input, shape index: {}]   ;;  %s2536_s5 = inlined_call_operand.hbm [shape: f32[1,256], index: 5, kind: input, shape index: {}]   ;;  %s2537_s6 = inlined_call_operand.hbm [shape: f32[4,128], index: 6, kind: input, shape index: {}]   ;;  %s2538_s7 = inlined_call_operand.hbm [shape: bf16[128,128], index: 7, kind: input, shape index: {}]   ;;  %s2539_s8 = inlined_call_operand.hbm [shape: f32[1,128], index: 8, kind: input, shape index: {}]   ;;  %s2540_s9 = inlined_call_operand.vmem [shape: f32[8,8,128], index: 9, kind: output, shape index: {0}]   ;;  %s2541_s10 = inlined_call_operand.vmem [shape: f32[8,8,128], index: 10, kind: output, shape index: {1}]  }
   0x1   :  { %17 = vsyncpa [#allocation6], 0 }
   0x2   :  { %18 = vsyncpa [#allocation9], 0 }
   0x3   :  { %19 = vsyncpa [#allocation12], 0  ;;  %s2155_s13 = smov 0  }
   0x4 LB: > { %s2086_s14 = smov [#allocation5]   ;;  %s2161_s16 = sadd.s32 4294967295, %s2076_s13   ;;  %s2076_s13 = sphi %s2155_s13, %s25_s13  }
   0x5   : > { %s305_s15 = sshll.u32 %s2086_s14, 4  ;;  %p1496_p0 = scmp.ge.s32.totalorder %s2076_s13, 1  ;;  %s2167_s15 = int_to_ptr.vmem [resolvable:$true] %s305_s15 }
   0x6   : > { %p276_p1 = scmp.lt.s32.totalorder %s2076_s13, 3  ;;  %p2542_p3 = scmp.eq.s32.totalorder %s2161_s16, 0 }
   0x7   : > { %s2087_s18 = smov [#allocation8]   ;;  %s2088_s20 = smov [#allocation3]  }
   0x8   : > { %p2169_p4 = pnand %p1496_p0, %p276_p1  ;;  %s330_s19 = sshll.u32 %s2087_s18, 4  ;;  %s2175_s19 = int_to_ptr.vmem [resolvable:$true] %s330_s19 }
   0x9   : > { %s291_s21 = sshll.u32 %s2088_s20, 4  ;;  %s2089_s23 = smov [#allocation7]   ;;  %s2183_s21 = int_to_ptr.vmem [resolvable:$true] %s291_s21 }
   0xa   : > { %s2544_s17 = scalar_select %p2169_p4, 1, 0 }
   0xb   : > { %p1667_p5 = pneg %p2169_p4  ;;  %s2185_s24 = sshll.u32 %s2089_s23, 4  ;;  %s320_s24 = int_to_ptr.vmem [resolvable:$true] %s2185_s24 }
   0xc   : > { %s1878_s27 = scalar_lea.hbm %s2534_s3, 64 }
   0xd   : > { %p2179_p6 = pnand %p2542_p3, %p1667_p5  ;;  %p1879_p7 = scmp.ne.s32.totalorder %s2534_s3, %s1878_s27 }
   0xe   : > { %p1885_p11 = scmp.lt.u32.totalorder %s1878_s27, %s2534_s3 }
   0xf   : > { %p2195_p8 = pneg %p2179_p6 }
  0x11   : > { %p1881_p9 = pnand %p2195_p8, %p1879_p7 }
  0x13   : > { %p1882_p10 = pneg %p1881_p9 }
  0x15   : > { %p1887_p12 = pnand %p1885_p11, %p1882_p10 }
  0x17   : > { %1890 = shalt.err (!%p1887_p12)
}
  0x18   : > { %s1891_s14 = scalar_lea.vmem %s2167_s15, 64  ;;  %p1899_p5 = scmp.lt.s32.totalorder %s2167_s15, %s2167_s15 }
  0x19   : > { %p1892_p13 = scmp.ne.s32.totalorder %s2167_s15, %s1891_s14  ;;  %p1900_p2 = scmp.lt.s32.totalorder %s1891_s14, %s1891_s14 }
  0x1b   : > { %p1894_p0 = pnand %p1892_p13, %p2195_p8  ;;  %p1901_p7 = por %p1900_p2, %p1899_p5 }
  0x1d   : > { %p1895_p1 = pneg %p1894_p0 }
  0x1f   : > { %p1902_p9 = pnand %p1901_p7, %p1895_p1 }
  0x21   : > { %1905 = shalt.err (!%p1902_p9)
}
  0x22   : > { %1673 = dma.hbm_to_vmem [thread:$0]  (!%p2179_p6), %s2534_s3, 64, %s2167_s15, [#allocation6]  }
  0x23   : > { %s1906_s26 = scalar_lea.hbm %s2537_s6, 64 }
  0x24   : > { %p1907_p10 = scmp.ne.s32.totalorder %s2537_s6, %s1906_s26  ;;  %p1913_p12 = scmp.lt.u32.totalorder %s1906_s26, %s2537_s6 }
  0x26   : > { %p1909_p2 = pnand %p1907_p10, %p2195_p8 }
  0x28   : > { %p1910_p11 = pneg %p1909_p2 }
  0x2a   : > { %p1915_p13 = pnand %p1913_p12, %p1910_p11 }
  0x2c   : > { %1918 = shalt.err (!%p1915_p13)
}
  0x2d   : > { %s1919_s15 = scalar_lea.vmem %s2175_s19, 64  ;;  %p1927_p7 = scmp.lt.s32.totalorder %s2175_s19, %s2175_s19 }
  0x2e   : > { %p1920_p0 = scmp.ne.s32.totalorder %s2175_s19, %s1919_s15  ;;  %p1928_p9 = scmp.lt.s32.totalorder %s1919_s15, %s1919_s15 }
  0x30   : > { %p1922_p1 = pnand %p1920_p0, %p2195_p8  ;;  %p1929_p10 = por %p1928_p9, %p1927_p7 }
  0x32   : > { %p1923_p5 = pneg %p1922_p1 }
  0x34   : > { %p1930_p2 = pnand %p1929_p10, %p1923_p5 }
  0x36   : > { %1933 = shalt.err (!%p1930_p2)
}
  0x37   : > { %1679 = dma.hbm_to_vmem [thread:$0]  (!%p2179_p6), %s2537_s6, 64, %s2175_s19, [#allocation9]  }
  0x38   : > { %s1934_s23 = scalar_lea.hbm %s2533_s2, 8192 }
  0x39   : > { %p1935_p11 = scmp.ne.s32.totalorder %s2533_s2, %s1934_s23  ;;  %p1941_p0 = scmp.lt.u32.totalorder %s1934_s23, %s2533_s2 }
  0x3b   : > { %p1937_p12 = pnand %p1935_p11, %p2195_p8 }
  0x3d   : > { %p1938_p13 = pneg %p1937_p12 }
  0x3f   : > { %p1943_p1 = pnand %p1941_p0, %p1938_p13 }
  0x41   : > { %1946 = shalt.err (!%p1943_p1)
}
  0x42   : > { %s1947_s19 = scalar_lea.vmem %s2183_s21, 8192  ;;  %p1955_p10 = scmp.lt.s32.totalorder %s2183_s21, %s2183_s21 }
  0x43   : > { %p1948_p5 = scmp.ne.s32.totalorder %s2183_s21, %s1947_s19  ;;  %p1956_p2 = scmp.lt.s32.totalorder %s1947_s19, %s1947_s19 }
  0x45   : > { %p1950_p7 = pnand %p1948_p5, %p2195_p8  ;;  %p1957_p11 = por %p1956_p2, %p1955_p10 }
  0x47   : > { %p1951_p9 = pneg %p1950_p7 }
  0x49   : > { %p1958_p12 = pnand %p1957_p11, %p1951_p9 }
  0x4b   : > { %1961 = shalt.err (!%p1958_p12)
}
  0x4c   : > { %s2090_s29 = smov 256   ;;  %s2091_s11 = smov 16  }
  0x4d   : > { %1670 = dma.hbm_to_vmem [thread:$0]  (!%p2179_p6), %s2533_s2, 8192, %s2183_s21, [#allocation4], %s2090_s29, %s2090_s29, %s2091_s11  }
  0x4e   : > { %s1962_s20 = scalar_lea.hbm %s2536_s5, 32 }
  0x4f   : > { %p1963_p13 = scmp.ne.s32.totalorder %s2536_s5, %s1962_s20  ;;  %p1969_p5 = scmp.lt.u32.totalorder %s1962_s20, %s2536_s5 }
  0x51   : > { %p1965_p0 = pnand %p1963_p13, %p2195_p8 }
  0x53   : > { %p1966_p1 = pneg %p1965_p0 }
  0x55   : > { %p1971_p7 = pnand %p1969_p5, %p1966_p1 }
  0x57   : > { %1974 = shalt.err (!%p1971_p7)
}
  0x58   : > { %s1975_s28 = scalar_lea.vmem %s320_s24, 32  ;;  %p1983_p11 = scmp.lt.s32.totalorder %s320_s24, %s320_s24 }
  0x59   : > { %p1976_p9 = scmp.ne.s32.totalorder %s320_s24, %s1975_s28  ;;  %p1984_p12 = scmp.lt.s32.totalorder %s1975_s28, %s1975_s28 }
  0x5b   : > { %p1978_p10 = pnand %p1976_p9, %p2195_p8  ;;  %p1985_p3 = por %p1984_p12, %p1983_p11 }
  0x5d   : > { %p1979_p2 = pneg %p1978_p10 }
  0x5f   : > { %p1986_p4 = pnand %p1985_p3, %p1979_p2 }
  0x61   : > { %1989 = shalt.err (!%p1986_p4)
}
  0x62   : > { %1676 = dma.hbm_to_vmem [thread:$0]  (!%p2179_p6), %s2536_s5, 32, %s320_s24, [#allocation6]  }
  0x63   : > { %s2092_s29 = smov [#allocation10]   ;;  %s1990_s14 = scalar_lea.hbm %s2538_s7, 1024 }
  0x64   : > { %s340_s11 = sshll.u32 %s2092_s29, 4  ;;  %p1991_p13 = scmp.ne.s32.totalorder %s2538_s7, %s1990_s14  ;;  %s341_s11 = int_to_ptr.vmem [resolvable:$true] %s340_s11 }
  0x65   : > { %p1997_p0 = scmp.lt.u32.totalorder %s1990_s14, %s2538_s7 }
  0x66   : > { %p1993_p3 = pnand %p1991_p13, %p2195_p8 }
  0x68   : > { %p1994_p4 = pneg %p1993_p3 }
  0x6a   : > { %p1999_p1 = pnand %p1997_p0, %p1994_p4 }
  0x6c   : > { %2002 = shalt.err (!%p1999_p1)
}
  0x6d   : > { %s2003_s24 = scalar_lea.vmem %s341_s11, 1024  ;;  %p2011_p10 = scmp.lt.s32.totalorder %s341_s11, %s341_s11 }
  0x6e   : > { %p2004_p5 = scmp.ne.s32.totalorder %s341_s11, %s2003_s24  ;;  %p2012_p2 = scmp.lt.s32.totalorder %s2003_s24, %s2003_s24 }
  0x70   : > { %p2006_p7 = pnand %p2004_p5, %p2195_p8  ;;  %p2013_p11 = por %p2012_p2, %p2011_p10 }
  0x72   : > { %p2007_p9 = pneg %p2006_p7 }
  0x74   : > { %p2014_p12 = pnand %p2013_p11, %p2007_p9 }
  0x76   : > { %2017 = shalt.err (!%p2014_p12)
}
  0x77   : > { %s2093_s26 = smov 64   ;;  %s2094_s27 = smov 4  }
  0x78   : > { %1682 = dma.hbm_to_vmem [thread:$0]  (!%p2179_p6), %s2538_s7, 1024, %s341_s11, [#allocation9], %s2093_s26, %s2093_s26, %s2094_s27  }
  0x79   : > { %s2095_s19 = smov [#allocation11]   ;;  %s2018_s14 = scalar_lea.hbm %s2539_s8, 16 }
  0x7a   : > { %s354_s29 = sshll.u32 %s2095_s19, 4  ;;  %p2019_p13 = scmp.ne.s32.totalorder %s2539_s8, %s2018_s14  ;;  %s355_s29 = int_to_ptr.vmem [resolvable:$true] %s354_s29 }
  0x7b   : > { %p2025_p0 = scmp.lt.u32.totalorder %s2018_s14, %s2539_s8 }
  0x7c   : > { %p2021_p3 = pnand %p2019_p13, %p2195_p8 }
  0x7e   : > { %p2022_p4 = pneg %p2021_p3 }
  0x80   : > { %p2027_p1 = pnand %p2025_p0, %p2022_p4 }
  0x82   : > { %2030 = shalt.err (!%p2027_p1)
}
  0x83   : > { %s2031_s11 = scalar_lea.vmem %s355_s29, 16  ;;  %s2038_s24 = scalar_lea.vmem %s355_s29, 32 }
  0x84   : > { %p2032_p5 = scmp.ne.s32.totalorder %s355_s29, %s2031_s11  ;;  %p2039_p10 = scmp.lt.s32.totalorder %s355_s29, %s355_s29 }
  0x85   : > { %p2040_p2 = scmp.lt.s32.totalorder %s2038_s24, %s2031_s11 }
  0x86   : > { %p2034_p7 = pnand %p2032_p5, %p2195_p8 }
  0x87   : > { %p2041_p11 = por %p2040_p2, %p2039_p10 }
  0x88   : > { %p2035_p9 = pneg %p2034_p7 }
  0x8a   : > { %p2042_p12 = pnand %p2041_p11, %p2035_p9 }
  0x8c   : > { %2045 = shalt.err (!%p2042_p12)
}
  0x8d   : > { %1685 = dma.hbm_to_vmem [thread:$0]  (!%p2179_p6), %s2539_s8, 16, %s355_s29, [#allocation12]  }
  0x8e   : > { %p2547_p13 = scmp.ne.s32.totalorder %s2544_s17, 0 }
  0x8f   : > { %p2548_p3 = scmp.eq.s32.totalorder (!%p2547_p13), %s2161_s16, 0 }
  0x90   : > { %376 = sbr.rel (%p2547_p13) target bundleno = 1707 (0x6ab), region = 56 }
  0x97   : > { %2059 = dma.done.wait (%p2548_p3), [#allocation4], 8192   ;;  %p2549_p8 = pmov %p2548_p3 }
  0x98   : > { %p2550_p4 = pmov %p2548_p3 }
  0x99   : > { %2061 = vsyncadd (%p2549_p8), [#allocation4], 4294959104 }
  0x9a   : > { %2063 = dma.done.wait (%p2550_p4), [#allocation6], 96   ;;  %p2551_p0 = pmov %p2548_p3 }
  0x9c   : > { %2065 = vsyncadd (%p2551_p0), [#allocation6], 4294967200  ;;  %p2552_p1 = pmov %p2551_p0 }
  0x9d   : > { %p2553_p6 = pmov %p2551_p0 }
  0x9e   : > { %2067 = dma.done.wait (%p2552_p1), [#allocation9], 1088  }
  0x9f   : > { %2069 = vsyncadd (%p2553_p6), [#allocation9], 4294966208  ;;  %p2554_p5 = pmov %p2551_p0 }
  0xa0   : > { %p2555_p7 = pmov %p2551_p0 }
  0xa1   : > { %2071 = dma.done.wait (%p2554_p5), [#allocation12], 16  }
  0xa2   : > { %2073 = vsyncadd (%p2555_p7), [#allocation12], 4294967280  ;;  %s1511_s17 = sshll.u32 %s2161_s16, 2  ;;  %p2556_p10 = scmp.ne.s32.totalorder %s2161_s16, 0 }
  0xa3   : > { %p440_p9 = scmp.lt.s32.totalorder %s1511_s17, 7  ;;  %v462_v0 = vld [vmem:[%s2532_s1] sm:$0xff] (!%p2556_p10) }
  0xa4   : > { %461 = sbr.rel (%p2556_p10) target bundleno = 171 (0xab), region = 84  ;;  %463 = vst [vmem:[#allocation2] sm:$0xff] (!%p2556_p10), %v462_v0 }
  0xa5   : > { %s2560_s17 = smov (!%p440_p9, %s1511_s17), 7 }
  0xa6   : > { %s2336_s22 = sshll.u32 %s2560_s17, 3 }
  0xa7   : > { %s443_s21 = scalar_lea.vmem %s2531_s0, %s2336_s22  ;;  %s449_s15 = scalar_lea.vmem %s2540_s9, %s2336_s22 }
  0xa8   : > { %s455_s18 = scalar_lea.vmem %s2541_s10, %s2336_s22 }
  0xab PF: > { %v2355_v1 = vld [vmem:[#allocation5] sm:$0xf]  ;;  %v2357_v2 = vld [vmem:[#allocation7] sm:$0x3]  ;;  %v2359_v3 = vld [vmem:[#allocation11] ss:$0 sm:$0xff]  ;;  %v468_v4 = vlaneseq }
  0xac   : > { %v492_v5 = vld [vmem:[#allocation2] sm:$0xff]   ;;  %v2365_v8 = vld [vmem:[#allocation8] sm:$0xf]  ;;  %v2096_v17 = vmov 0.0   ;;  %s2397_s16 = smov 0  }
  0xad   : > { %v2361_v6 = vshrl.u32 %v468_v4, 7  ;;  %v2363_v7 = vand.u32 127, %v468_v4 }
  0xaf   : > { %v2368_v9 = vsub.s32 0, %v2361_v6  ;;  %v2371_v10 = vsub.s32 1, %v2361_v6  ;;  %v478_v11 = vsub.s32 2, %v2361_v6  ;;  %v482_v12 = vsub.s32 3, %v2361_v6 }
  0xb0   : > { %vm486_vm0 = vcmp.lt.s32.totalorder %v2363_v7, 4  ;;  %vm489_vm1 = vcmp.eq.s32.totalorder %v2363_v7, 16 }
  0xb1   : > { %v471_v13 = vrot.slane %v2365_v8, %v2368_v9  ;;  %v475_v14 = vrot.slane %v2365_v8, %v2371_v10  ;;  %v2384_v15 = vrot.slane %v2365_v8, %v478_v11  ;;  %v2389_v16 = vrot.slane %v2365_v8, %v482_v12 }
  0xb2   : > { %v2391_v18 = vsel %vm486_vm0, 1.0, %v2096_v17  ;;  %v2393_v19 = vsel %vm489_vm1, 1.0, %v2096_v17 }
  0xb3 LB: >> { %v1736_v20 = vld [vmem:[#allocation3 + $0x4] ss:$16 sps:$4 sm:$0xff]   ;;  %v1738_v21 = vld [vmem:[#allocation3] ss:$16 sps:$4 sm:$0xff]   ;;  %v504_v23 = vpack.c.bf16 %v2080_v5, %v2080_v5  ;;  %v1754_v28 = vld [vmem:[#allocation3 + $0xc] ss:$16 sps:$4 sm:$0xff]   ;;  %s2084_s16 = sphi %s2397_s16, %s498_s16   ;;  %v2080_v5 = vphi %v492_v5, %v2558_v5  }
  0xb4   : >> { %910 = vmatprep.subr.bf16.mxu0 %v1736_v20  ;;  %v1739_v22 = vld [vmem:[#allocation3 + $0x24] ss:$16 sps:$4 sm:$0xff]   ;;  %v1741_v24 = vld [vmem:[#allocation3 + $0x20] ss:$16 sps:$4 sm:$0xff]   ;;  %v1756_v29 = vld [vmem:[#allocation3 + $0x8] ss:$16 sps:$4 sm:$0xff]   ;;  %951 = vmatprep.subr.bf16.mxu1 %v1754_v28 }
  0xb5   : >> { %911 = vmatpush1.bf16.msra.mxu0 %v1738_v21  ;;  %v1742_v25 = vld [vmem:[#allocation3 + $0x44] ss:$16 sps:$4 sm:$0xff]   ;;  %942 = vmatprep.mubr.bf16.mxu0 %v504_v23  ;;  %v1744_v26 = vld [vmem:[#allocation3 + $0x40] ss:$16 sps:$4 sm:$0xff]   ;;  %v1760_v31 = vld [vmem:[#allocation3 + $0x2c] ss:$16 sps:$4 sm:$0xff]  }
  0xb6   : >> { %912 = vmatprep.subr.bf16.mxu0 %v1739_v22  ;;  %983 = vmatprep.mubr.bf16.mxu1 %v504_v23  ;;  %v1745_v27 = vld [vmem:[#allocation3 + $0x64] ss:$16 sps:$4 sm:$0xff]   ;;  %v1747_v30 = vld [vmem:[#allocation3 + $0x60] ss:$16 sps:$4 sm:$0xff]   ;;  %v1762_v32 = vld [vmem:[#allocation3 + $0x28] ss:$16 sps:$4 sm:$0xff]  }
  0xb7   : >> { %952 = vmatpush1.bf16.msra.mxu1 %v1756_v29  ;;  %v1748_v33 = vld [vmem:[#allocation3 + $0x84] ss:$16 sps:$4 sm:$0xff]   ;;  %v1750_v34 = vld [vmem:[#allocation3 + $0x80] ss:$16 sps:$4 sm:$0xff]   ;;  %v1766_v35 = vld [vmem:[#allocation3 + $0x4c] ss:$16 sps:$4 sm:$0xff]  }
  0xb8   : >> { %953 = vmatprep.subr.bf16.mxu1 %v1760_v31  ;;  %v1751_v36 = vld [vmem:[#allocation3 + $0xa4] ss:$16 sps:$4 sm:$0xff]   ;;  %v1768_v37 = vld [vmem:[#allocation3 + $0x48] ss:$16 sps:$4 sm:$0xff]   ;;  %v1772_v38 = vld [vmem:[#allocation3 + $0x6c] ss:$16 sps:$4 sm:$0xff]  }
  0xb9   : >> { %913 = vmatpush1.bf16.msra.mxu0 %v1741_v24  ;;  %v1753_v39 = vld [vmem:[#allocation3 + $0xa0] ss:$16 sps:$4 sm:$0xff]   ;;  %v1757_v40 = vld [vmem:[#allocation3 + $0xc4] ss:$16 sps:$4 sm:$0xff]   ;;  %v1774_v41 = vld [vmem:[#allocation3 + $0x68] ss:$16 sps:$4 sm:$0xff]  }
  0xba   : >> { %914 = vmatprep.subr.bf16.mxu0 %v1742_v25  ;;  %v1778_v42 = vld [vmem:[#allocation3 + $0x8c] ss:$16 sps:$4 sm:$0xff]   ;;  %v1759_v43 = vld [vmem:[#allocation3 + $0xc0] ss:$16 sps:$4 sm:$0xff]   ;;  %v1763_v44 = vld [vmem:[#allocation3 + $0xe4] ss:$16 sps:$4 sm:$0xff]  }
  0xbb   : >> { %954 = vmatpush1.bf16.msra.mxu1 %v1762_v32  ;;  %v1780_v45 = vld [vmem:[#allocation3 + $0x88] ss:$16 sps:$4 sm:$0xff]   ;;  %v1784_v46 = vld [vmem:[#allocation3 + $0xac] ss:$16 sps:$4 sm:$0xff]   ;;  %v1765_v47 = vld [vmem:[#allocation3 + $0xe0] ss:$16 sps:$4 sm:$0xff]  }
  0xbc   : >> { %955 = vmatprep.subr.bf16.mxu1 %v1766_v35  ;;  %v1769_v48 = vld [vmem:[#allocation3 + $0x104] ss:$16 sps:$4 sm:$0xff]   ;;  %v1786_v49 = vld [vmem:[#allocation3 + $0xa8] ss:$16 sps:$4 sm:$0xff]   ;;  %v1790_v50 = vld [vmem:[#allocation3 + $0xcc] ss:$16 sps:$4 sm:$0xff]  }
  0xbd   : >> { %915 = vmatpush1.bf16.msra.mxu0 %v1744_v26  ;;  %v1771_v51 = vld [vmem:[#allocation3 + $0x100] ss:$16 sps:$4 sm:$0xff]   ;;  %v1775_v52 = vld [vmem:[#allocation3 + $0x124] ss:$16 sps:$4 sm:$0xff]   ;;  %v1792_v53 = vld [vmem:[#allocation3 + $0xc8] ss:$16 sps:$4 sm:$0xff]  }
  0xbe   : >> { %916 = vmatprep.subr.bf16.mxu0 %v1745_v27  ;;  %v1796_v54 = vld [vmem:[#allocation3 + $0xec] ss:$16 sps:$4 sm:$0xff]   ;;  %v1777_v55 = vld [vmem:[#allocation3 + $0x120] ss:$16 sps:$4 sm:$0xff]   ;;  %v1781_v56 = vld [vmem:[#allocation3 + $0x144] ss:$16 sps:$4 sm:$0xff]  }
  0xbf   : >> { %956 = vmatpush1.bf16.msra.mxu1 %v1768_v37  ;;  %v1798_v57 = vld [vmem:[#allocation3 + $0xe8] ss:$16 sps:$4 sm:$0xff]   ;;  %v1802_v58 = vld [vmem:[#allocation3 + $0x10c] ss:$16 sps:$4 sm:$0xff]   ;;  %v1783_v59 = vld [vmem:[#allocation3 + $0x140] ss:$16 sps:$4 sm:$0xff]  }
  0xc0   : >> { %957 = vmatprep.subr.bf16.mxu1 %v1772_v38  ;;  %v1787_v60 = vld [vmem:[#allocation3 + $0x164] ss:$16 sps:$4 sm:$0xff]   ;;  %v1804_v61 = vld [vmem:[#allocation3 + $0x108] ss:$16 sps:$4 sm:$0xff]   ;;  %v1808_v62 = vld [vmem:[#allocation3 + $0x12c] ss:$16 sps:$4 sm:$0xff]  }
  0xc1   : >> { %917 = vmatpush1.bf16.msra.mxu0 %v1747_v30  ;;  %v1789_v63 = vld [vmem:[#allocation3 + $0x160] ss:$16 sps:$4 sm:$0xff]   ;;  %v1793_v0 = vld [vmem:[#allocation3 + $0x184] ss:$16 sps:$4 sm:$0xff]   ;;  %v1810_v4 = vld [vmem:[#allocation3 + $0x128] ss:$16 sps:$4 sm:$0xff]  }
  0xc2   : >> { %918 = vmatprep.subr.bf16.mxu0 %v1748_v33  ;;  %v1814_v17 = vld [vmem:[#allocation3 + $0x14c] ss:$16 sps:$4 sm:$0xff]   ;;  %v1795_v20 = vld [vmem:[#allocation3 + $0x180] ss:$16 sps:$4 sm:$0xff]   ;;  %v1816_v21 = vld [vmem:[#allocation3 + $0x148] ss:$16 sps:$4 sm:$0xff]  }
  0xc3   : >> { %958 = vmatpush1.bf16.msra.mxu1 %v1774_v41  ;;  %v1799_v22 = vld [vmem:[#allocation3 + $0x1a4] ss:$16 sps:$4 sm:$0xff]   ;;  %v1817_v23 = vld [vmem:[#allocation3 + $0x16c] ss:$16 sps:$4 sm:$0xff]   ;;  %v1801_v24 = vld [vmem:[#allocation3 + $0x1a0] ss:$16 sps:$4 sm:$0xff]  }
  0xc4   : >> { %959 = vmatprep.subr.bf16.mxu1 %v1778_v42  ;;  %v1819_v25 = vld [vmem:[#allocation3 + $0x168] ss:$16 sps:$4 sm:$0xff]   ;;  %v1805_v26 = vld [vmem:[#allocation3 + $0x1c4] ss:$16 sps:$4 sm:$0xff]   ;;  %v1820_v27 = vld [vmem:[#allocation3 + $0x18c] ss:$16 sps:$4 sm:$0xff]  }
  0xc5   : >> { %919 = vmatpush1.bf16.msra.mxu0 %v1750_v34  ;;  %s2408_s25 = sshll.u32 %s2084_s16, 3  ;;  %v1807_v28 = vld [vmem:[#allocation3 + $0x1c0] ss:$16 sps:$4 sm:$0xff]   ;;  %v1822_v29 = vld [vmem:[#allocation3 + $0x188] ss:$16 sps:$4 sm:$0xff]   ;;  %vm1162_vm2 = vcmask 31744  }
  0xc6   : >> { %920 = vmatprep.subr.bf16.mxu0 %v1751_v36  ;;  %v1811_v30 = vld [vmem:[#allocation3 + $0x1e4] ss:$16 sps:$4 sm:$0xff]   ;;  %s501_s26 = scalar_lea.vmem %s443_s21, %s2408_s25  ;;  %v1823_v31 = vld [vmem:[#allocation3 + $0x1ac] ss:$16 sps:$4 sm:$0xff]   ;;  %v1813_v32 = vld [vmem:[#allocation3 + $0x1e0] ss:$16 sps:$4 sm:$0xff]   ;;  %s1011_s20 = scalar_lea.vmem %s449_s15, %s2408_s25 }
  0xc7   : >> { %960 = vmatpush1.bf16.msra.mxu1 %v1780_v45  ;;  %v502_v33 = vld [vmem:[%s501_s26] sm:$0xff]  ;;  %v1835_v42 = vld [vmem:[%s2535_s4 + $0x10] ss:$8 sps:$4 sm:$0xff]   ;;  %vm2099_vm5 = vmmov 0   ;;  %s1327_s24 = scalar_lea.vmem %s455_s18, %s2408_s25  ;;  %s498_s16 = sadd.s32 1, %s2084_s16  }
  0xc8   : >> { %961 = vmatprep.subr.bf16.mxu1 %v1784_v46  ;;  %v1825_v34 = vld [vmem:[#allocation3 + $0x1a8] ss:$16 sps:$4 sm:$0xff]   ;;  %v1826_v35 = vld [vmem:[#allocation3 + $0x1cc] ss:$16 sps:$4 sm:$0xff]   ;;  %v503_v36 = vpack.c.bf16 %v502_v33, %v502_v33  ;;  %p495_p2 = scmp.ge.s32.totalorder %s498_s16, 4  }
  0xc9   : >> { %921 = vmatpush1.bf16.msra.mxu0 %v1753_v39  ;;  %v1828_v37 = vld [vmem:[#allocation3 + $0x1c8] ss:$16 sps:$4 sm:$0xff]   ;;  %v1829_v38 = vld [vmem:[#allocation3 + $0x1ec] ss:$16 sps:$4 sm:$0xff]  }
  0xca   : >> { %922 = vmatprep.subr.bf16.mxu0 %v1757_v40  ;;  %v1831_v39 = vld [vmem:[#allocation3 + $0x1e8] ss:$16 sps:$4 sm:$0xff]   ;;  %v1834_v40 = vld [vmem:[%s2535_s4 + $0x4] ss:$8 sps:$4 sm:$0xff]   ;;  %v1843_v46 = vld [vmem:[%s2535_s4 + $0x34] ss:$8 sps:$4 sm:$0xff]  }
  0xcb   : >> { %962 = vmatpush1.bf16.msra.mxu1 %v1786_v49  ;;  %v1832_v41 = vld [vmem:[%s2535_s4] ss:$8 sps:$4 sm:$0xff]  }
  0xcc   : >> { %963 = vmatprep.subr.bf16.mxu1 %v1790_v50  ;;  %v1838_v45 = vld [vmem:[%s2535_s4 + $0x20] ss:$8 sps:$4 sm:$0xff]   ;;  %v1849_v50 = vld [vmem:[%s2535_s4 + $0x54] ss:$8 sps:$4 sm:$0xff]  }
  0xcd   : >> { %923 = vmatpush1.bf16.msra.mxu0 %v1759_v43  ;;  %v1837_v43 = vld [vmem:[%s2535_s4 + $0x14] ss:$8 sps:$4 sm:$0xff]   ;;  %v1844_v49 = vld [vmem:[%s2535_s4 + $0x40] ss:$8 sps:$4 sm:$0xff]  }
  0xce   : >> { %924 = vmatprep.subr.bf16.mxu0 %v1763_v44  ;;  %v1840_v44 = vld [vmem:[%s2535_s4 + $0x24] ss:$8 sps:$4 sm:$0xff]  }
  0xcf   : >> { %964 = vmatpush1.bf16.msra.mxu1 %v1792_v53  ;;  %v2097_v53 = vmov 0  }
  0xd0   : >> { %965 = vmatprep.subr.bf16.mxu1 %v1796_v54  ;;  %v1850_v54 = vld [vmem:[%s2535_s4 + $0x60] ss:$8 sps:$4 sm:$0xff]  }
  0xd1   : >> { %925 = vmatpush1.bf16.msra.mxu0 %v1765_v47  ;;  %v1841_v47 = vld [vmem:[%s2535_s4 + $0x30] ss:$8 sps:$4 sm:$0xff]  }
  0xd2   : >> { %926 = vmatprep.subr.bf16.mxu0 %v1769_v48  ;;  %v1846_v48 = vld [vmem:[%s2535_s4 + $0x44] ss:$8 sps:$4 sm:$0xff]  }
  0xd3   : >> { %966 = vmatpush1.bf16.msra.mxu1 %v1798_v57  ;;  %v573_v57 = vrot.slane %v2355_v1, %v2368_v9 }
  0xd4   : >> { %967 = vmatprep.subr.bf16.mxu1 %v1802_v58 }
  0xd5   : >> { %927 = vmatpush1.bf16.msra.mxu0 %v1771_v51  ;;  %v1847_v51 = vld [vmem:[%s2535_s4 + $0x50] ss:$8 sps:$4 sm:$0xff]  }
  0xd6   : >> { %928 = vmatprep.subr.bf16.mxu0 %v1775_v52  ;;  %v1852_v52 = vld [vmem:[%s2535_s4 + $0x64] ss:$8 sps:$4 sm:$0xff]  }
  0xd7   : >> { %968 = vmatpush1.bf16.msra.mxu1 %v1804_v61 }
  0xd8   : >> { %969 = vmatprep.subr.bf16.mxu1 %v1808_v62 }
  0xd9   : >> { %929 = vmatpush1.bf16.msra.mxu0 %v1777_v55  ;;  %v1855_v55 = vld [vmem:[%s2535_s4 + $0x74] ss:$8 sps:$4 sm:$0xff]  }
  0xda   : >> { %930 = vmatprep.subr.bf16.mxu0 %v1781_v56  ;;  %v1853_v56 = vld [vmem:[%s2535_s4 + $0x70] ss:$8 sps:$4 sm:$0xff]  }
  0xdb   : >> { %970 = vmatpush1.bf16.msra.mxu1 %v1810_v4 }
  0xdc   : >> { %971 = vmatprep.subr.bf16.mxu1 %v1814_v17 }
  0xdd   : >> { %931 = vmatpush1.bf16.msra.mxu0 %v1783_v59  ;;  %v577_v59 = vrot.slane %v2355_v1, %v2371_v10 }
  0xde   : >> { %932 = vmatprep.subr.bf16.mxu0 %v1787_v60 }
  0xdf   : >> { %972 = vmatpush1.bf16.msra.mxu1 %v1816_v21 }
  0xe0   : >> { %973 = vmatprep.subr.bf16.mxu1 %v1817_v23 }
  0xe1   : >> { %933 = vmatpush1.bf16.msra.mxu0 %v1789_v63 }
  0xe2   : >> { %934 = vmatprep.subr.bf16.mxu0 %v1793_v0 }
  0xe3   : >> { %974 = vmatpush1.bf16.msra.mxu1 %v1819_v25 }
  0xe4   : >> { %975 = vmatprep.subr.bf16.mxu1 %v1820_v27 }
  0xe5   : >> { %935 = vmatpush1.bf16.msra.mxu0 %v1795_v20 }
  0xe6   : >> { %936 = vmatprep.subr.bf16.mxu0 %v1799_v22 }
  0xe7   : >> { %976 = vmatpush1.bf16.msra.mxu1 %v1822_v29  ;;  %v581_v29 = vrot.slane %v2355_v1, %v478_v11 }
  0xe8   : >> { %977 = vmatprep.subr.bf16.mxu1 %v1823_v31 }
  0xe9   : >> { %937 = vmatpush1.bf16.msra.mxu0 %v1801_v24 }
  0xea   : >> { %938 = vmatprep.subr.bf16.mxu0 %v1805_v26  ;;  %v585_v26 = vrot.slane %v2355_v1, %v482_v12 }
  0xeb   : >> { %978 = vmatpush1.bf16.msra.mxu1 %v1825_v34 }
  0xec   : >> { %979 = vmatprep.subr.bf16.mxu1 %v1826_v35 }
  0xed   : >> { %939 = vmatpush1.bf16.msra.mxu0 %v1807_v28 }
  0xee   : >> { %940 = vmatprep.subr.bf16.mxu0 %v1811_v30 }
  0xef   : >> { %980 = vmatpush1.bf16.msra.mxu1 %v1828_v37 }
  0xf0   : >> { %981 = vmatprep.subr.bf16.mxu1 %v1829_v38 }
  0xf1   : >> { %941 = vmatpush1.bf16.msra.mxu0 %v1813_v32 }
  0xf2   : >> { %1121 = vmatprep.subr.bf16.mxu0 %v1834_v40 }
  0xf3   : >> { %982 = vmatpush1.bf16.msra.mxu1 %v1831_v39 }
  0xf4   : >> { %943 = vmatmul.mubr.bf16.vlgmr.msra.gmra.mrb[0].mxu0 %v503_v36 }
  0xf5   : >> { %1122 = vmatpush1.bf16.msra.mxu0 %v1832_v41  ;;  %1153 = vmatprep.mubr.bf16.mxu0 %v2097_v53 }
  0xf6   : >> { %984 = vmatmul.mubr.bf16.vlgmr.msra.gmra.mrb[0].mxu1 %v503_v36  ;;  %1123 = vmatprep.subr.bf16.mxu0 %v1837_v43 }
  0xf9   : >> { %1124 = vmatpush1.bf16.msra.mxu0 %v1835_v42  ;;  %v1034_v42 = vrot.slane %v2357_v2, %v2368_v9 }
  0xfa   : >> { %1125 = vmatprep.subr.bf16.mxu0 %v1840_v44 }
  0xfd   : >> { %1126 = vmatpush1.bf16.msra.mxu0 %v1838_v45 }
  0xfe   : >> { %1127 = vmatprep.subr.bf16.mxu0 %v1843_v46 }
 0x101   : >> { %1128 = vmatpush1.bf16.msra.mxu0 %v1841_v47 }
 0x102   : >> { %1129 = vmatprep.subr.bf16.mxu0 %v1846_v48 }
 0x105   : >> { %1130 = vmatpush1.bf16.msra.mxu0 %v1844_v49 }
 0x106   : >> { %1131 = vmatprep.subr.bf16.mxu0 %v1849_v50 }
 0x109   : >> { %1132 = vmatpush1.bf16.msra.mxu0 %v1847_v51 }
 0x10a   : >> { %1133 = vmatprep.subr.bf16.mxu0 %v1852_v52 }
 0x10d   : >> { %1134 = vmatpush1.bf16.msra.mxu0 %v1850_v54 }
 0x10e   : >> { %1135 = vmatprep.subr.bf16.mxu0 %v1855_v55 }
 0x111   : >> { %1136 = vmatpush1.bf16.msra.mxu0 %v1853_v56 }
 0x1c7   : >> { %v944_v58 = vpop.f32.mrb[0].mxu0 }
 0x1c8   : >> { %v945_v60 = vadd.f32 %v944_v58, %v573_v57  ;;  %v946_v61 = vpop.f32.mrb[1].mxu0 }
 0x1c9   : >> { %v948_v62 = vpop.f32.mrb[2].mxu0  ;;  %v947_v4 = vadd.f32 %v946_v61, %v577_v59  ;;  %v985_v20 = vpop.f32.mrb[0].mxu1 }
 0x1ca   : >> { %v1585_v63 = vmul.f32 -1.442695, %v945_v60  ;;  %v949_v0 = vpop.f32.mrb[3].mxu0  ;;  %v987_v21 = vpop.f32.mrb[1].mxu1  ;;  %v986_v32 = vadd.f32 %v985_v20, %v581_v29  ;;  %v1858_v20 = vld [vmem:[#allocation10 + $0x10] sm:$0xff]   ;;  %v1863_v29 = vld [vmem:[#allocation10 + $0x38] sm:$0xff]  }
 0x1cb   : >> { %v1586_v17 = vmul.f32 -1.442695, %v947_v4  ;;  %v989_v22 = vpop.f32.mrb[2].mxu1  ;;  %v988_v30 = vadd.f32 %v987_v21, %v585_v26  ;;  %v1856_v0 = vld [vmem:[#allocation10] sm:$0xff]   ;;  %v2098_v4 = vmov 0.0   ;;  %v1859_v21 = vld [vmem:[#allocation10 + $0x18] sm:$0xff]  }
 0x1cc   : >> { %1864 = vpow2.f32 %v1585_v63  ;;  %v990_v23 = vpop.f32.mrb[3].mxu1  ;;  %1623 = vmatprep.subr.bf16.mxu1 %v2098_v4  ;;  %v1860_v22 = vld [vmem:[#allocation10 + $0x20] sm:$0xff]   ;;  %1639 = vmatprep.mubr.msk.bf16.mxu1 %vm2099_vm5, %v2098_v4 }
 0x1cd   : >> { %1866 = vpow2.f32 %v1586_v17  ;;  %1624 = vmatpush3.bf16.msra.mxu1 %v1856_v0  ;;  %v1857_v17 = vld [vmem:[#allocation10 + $0x8] sm:$0xff]  }
 0x1ce   : >> { %1625 = vmatprep.subr.bf16.mxu1 %v2098_v4 }
 0x1d1   : >> { %1626 = vmatpush3.bf16.msra.mxu1 %v1857_v17 }
 0x1d2   : >> { %1627 = vmatprep.subr.bf16.mxu1 %v2098_v4 }
 0x1d5   : >> { %1628 = vmatpush3.bf16.msra.mxu1 %v1858_v20 }
 0x1d6   : >> { %v1865_v24 = vpop.eup %1864  ;;  %1629 = vmatprep.subr.bf16.mxu1 %v2098_v4 }
 0x1d7   : >> { %v995_v25 = vadd.f32 1.0, %v1865_v24  ;;  %v1867_v27 = vpop.eup %1866 }
 0x1d8   : >> { %v1001_v28 = vadd.f32 1.0, %v1867_v27  ;;  %v1861_v27 = vld [vmem:[#allocation10 + $0x28] sm:$0xff]  }
 0x1d9   : >> { %1868 = vrcp.f32 %v995_v25  ;;  %1630 = vmatpush3.bf16.msra.mxu1 %v1859_v21 }
 0x1da   : >> { %1870 = vrcp.f32 %v1001_v28  ;;  %1631 = vmatprep.subr.bf16.mxu1 %v2098_v4  ;;  %v1862_v28 = vld [vmem:[#allocation10 + $0x30] sm:$0xff]  }
 0x1dd   : >> { %1632 = vmatpush3.bf16.msra.mxu1 %v1860_v22 }
 0x1de   : >> { %1633 = vmatprep.subr.bf16.mxu1 %v2098_v4 }
 0x1e1   : >> { %1634 = vmatpush3.bf16.msra.mxu1 %v1861_v27 }
 0x1e2   : >> { %1635 = vmatprep.subr.bf16.mxu1 %v2098_v4 }
 0x1e3   : >> { %v1869_v31 = vpop.eup %1868 }
 0x1e4   : >> { %v1004_v33 = vmul.f32 %v1869_v31, %v988_v30  ;;  %v1871_v35 = vpop.eup %1870 }
 0x1e5   : >> { %v1007_v36 = vsub.f32 1.0, %v1871_v35  ;;  %v1009_v39 = vmul.f32 %v2080_v5, %v1871_v35  ;;  %1636 = vmatpush3.bf16.msra.mxu1 %v1862_v28 }
 0x1e6   : >> { %v1005_v34 = vadd.f32 %v1004_v33, %v986_v32  ;;  %1637 = vmatprep.subr.bf16.mxu1 %v2098_v4 }
 0x1e8   : >> { %1872 = vtanh.f32 %v1005_v34  ;;  %v1038_v34 = vrot.slane %v2357_v2, %v2371_v10 }
 0x1e9   : >> { %1638 = vmatpush3.bf16.msra.mxu1 %v1863_v29 }
 0x1f2   : >> { %v1873_v37 = vpop.eup %1872 }
 0x1f3   : >> { %v1008_v38 = vmul.f32 %v1873_v37, %v1007_v36 }
 0x1f5   : >> { %v2481_v5 = vadd.f32 %v1009_v39, %v1008_v38  }
 0x1f7   : >> { %v2557_v40 = vmov %v2481_v5 }
 0x1f8   : >> { %1012 = vst [vmem:[%s1011_s20] sm:$0xff] %v2557_v40  ;;  %v1013_v41 = vpack.c.bf16 %v2557_v40, %v2557_v40  ;;  %1329 = vst [vmem:[#allocation2] sm:$0xff] (%p495_p2), %v2557_v40 }
 0x1fa   : >> { %1154 = vmatmul.mubr.bf16.vlgmr.msra.gmra.mrb[4].mxu0 %v1013_v41 }
 0x2cd   : >> { %v1155_v43 = vpop.f32.mrb[4].mxu0 }
 0x2ce   : >> { %v2488_v44 = vadd.f32 %v1155_v43, %v1034_v42  ;;  %v2490_v45 = vpop.f32.mrb[5].mxu0 }
 0x2cf   : >> { %v1159_v46 = vpop.f32.mrb[6].mxu0  ;;  %v1158_v37 = vadd.f32 %v2490_v45, %v1038_v34 }
 0x2d0   : >> { %v1160_v47 = vpop.f32.mrb[7].mxu0  ;;  %v1163_v5 = vsel %vm1162_vm2, %v2488_v44, -inf }
 0x2d1   : >> { %1164 = vmax.xlane.f32.xlu0 %v1163_v5 }
 0x35e   : >> { %v1165_v48 = vpop.xlane.xlu0 %1164 }
 0x35f   : >> { %v1166_v49 = vsub.f32 %v2488_v44, %v1165_v48 }
 0x361   : >> { %v1167_v50 = vmul.f32 1.442695, %v1166_v49 }
 0x363   : >> { %1874 = vpow2.f32 %v1167_v50 }
 0x36d   : >> { %v1875_v51 = vpop.eup %1874 }
 0x36e   : >> { %v1169_v52 = vsel %vm1162_vm2, %v1875_v51, 0.0 }
 0x36f   : >> { %1170 = vadd.xlane.f32.xlu0 %v1169_v52 }
 0x3fc   : >> { %v1171_v53 = vpop.xlane.xlu0 %1170 }
 0x3fd   : >> { %1876 = vlog2.f32 %v1171_v53 }
 0x407   : >> { %v1877_v54 = vpop.eup %1876 }
 0x408   : >> { %v1173_v55 = vmul.f32 0.6931472, %v1877_v54 }
 0x40a   : >> { %v1174_v56 = vadd.f32 %v1173_v55, %v1165_v48 }
 0x40c   : >> { %v1175_v57 = vsub.f32 %v2488_v44, %v1174_v56  ;;  %v1321_v46 = vmul.f32 %v2391_v18, %v1174_v56 }
 0x40e   : >> { %v1176_v58 = vsel %vm1162_vm2, %v1175_v57, -inf  ;;  %v1322_v48 = vsub.f32 %v2488_v44, %v1321_v46 }
 0x40f   : >> { %1177 = vmax.xlane.f32.xlu1 %v1176_v58 }
 0x49c   : >> { %v1178_v59 = vpop.xlane.xlu1 %1177 }
 0x49d   : >> { %vm1179_vm3 = vcmp.eq.f32.partialorder %v1175_v57, %v1178_v59 }
 0x49e   : >> { %v1180_v60 = vsel %vm1179_vm3, %v2363_v7, 4 }
 0x49f   : >> { %v1181_v61 = vsel %vm1162_vm2, %v1180_v60, 2147483647 }
 0x4a0   : >> { %v1183_v62 = vshra.s32 %v1181_v61, 16  ;;  %v1182_v23 = vand.u32 65535, %v1181_v61 }
 0x4a2   : >> { %v1185_v63 = vcvt.s32.f32 %v1183_v62  ;;  %v1184_v25 = vcvt.s32.f32 %v1182_v23 }
 0x4a4   : >> { %1186 = vmin.xlane.f32.xlu1 %v1185_v63 }
 0x531   : >> { %v1187_v24 = vpop.xlane.xlu1 %1186 }
 0x532   : >> { %vm1188_vm4 = vcmp.eq.f32.partialorder %v1185_v63, %v1187_v24  ;;  %v1193_v30 = vcvt.f32.s32 %v1187_v24 }
 0x533   : >> { %v1189_v26 = vsel %vm1188_vm4, %v1184_v25, inf }
 0x534   : >> { %1190 = vmin.xlane.f32.xlu0 %v1189_v26  ;;  %v1194_v32 = vshll.u32 %v1193_v30, 16 }
 0x5c1   : >> { %v1191_v31 = vpop.xlane.xlu0 %1190 }
 0x5c2   : >> { %v1192_v33 = vcvt.f32.s32 %v1191_v31 }
 0x5c4   : >> { %v1195_v35 = vadd.s32 %v1194_v32, %v1192_v33 }
 0x5c6   : >> { %vm1196_vm6 = vcmp.eq.s32.totalorder %v1195_v35, 2  ;;  %vm1200_vm7 = vcmp.eq.s32.totalorder %v1195_v35, 1  ;;  %vm1204_vm8 = vcmp.eq.s32.totalorder %v1195_v35, 0  ;;  %v1324_v47 = vcvt.s32.f32 %v1195_v35 }
 0x5c7   : >> { %v1199_v36 = vsel %vm1196_vm6, %v2384_v15, %v2389_v16 }
 0x5c8   : >> { %v1203_v38 = vsel %vm1200_vm7, %v475_v14, %v1199_v36  ;;  %v1325_v52 = vmul.f32 %v2393_v19, %v1324_v47 }
 0x5c9   : >> { %v1207_v39 = vsel %vm1204_vm8, %v471_v13, %v1203_v38 }
 0x5ca   : >> { %v1208_v41 = vadd.f32 %v1207_v39, %v1158_v37 }
 0x5cc   : >> { %v1209_v42 = vmax.f32 %v1208_v41, 0.0 }
 0x5ce   : >> { %v1210_v43 = vpack.c.bf16 %v1209_v42, %v1209_v42 }
 0x5d0   : >> { %1640 = vmatmul.mubr.bf16.vlgmr.msra.gmra.mrb[4].mxu1 %v1210_v43 }
 0x6a3   : >> { %v1315_v5 = vpop.f32.mrb[4].mxu1 }
 0x6a4   : >> { %v1316_v45 = vadd.f32 %v2359_v3, %v1315_v5  ;;  %v1641_v49 = vpop.f32.mrb[5].mxu1  ;;  %v2558_v5 = vmov %v2557_v40  ;;  %497 = sbr.rel (!%p495_p2) target bundleno = 179 (0xb3), region = 137 }
 0x6a5   : >> { %v1318_v50 = vpop.f32.mrb[6].mxu1 }
 0x6a6   : >> { %v1323_v51 = vadd.f32 %v1322_v48, %v1316_v45  ;;  %v1642_v53 = vpop.f32.mrb[7].mxu1 }
 0x6a8   : >> { %v1326_v54 = vadd.f32 %v1325_v52, %v1323_v51 }
 0x6aa   : >> { %1328 = vst [vmem:[%s1327_s24] sm:$0xff] %v1326_v54 }
 0x6ab PF: > { %s25_s13 = sadd.s32 1, %s2076_s13  }
 0x6ac   : > { %p22_p11 = scmp.ge.s32.totalorder %s25_s13, 4  }
 0x6ae   :  { %24 = sbr.rel (!%p22_p11) target bundleno = 4 (0x4), region = 148 }
 0x6b5   :  { %1369 = vsyncpa [#allocation4], 1 }
 0x6b6   :  { %1371 = vsyncpa [#allocation4 + $0x1], 1 }
 0x6b7   :  { %1372 = vsyncpa [#allocation6], 1 }
 0x6b8   :  { %1373 = vsyncpa [#allocation9], 1 }
 0x6b9   :  { %1374 = vsyncpa [#allocation12], 1 }

</bundles_post_ra>
